<compile_context>
chip_gen: v5e
topology: v5e:2x2
jax: 0.10.0
libtpu: 0.0.40
codegen_flags: <defaults>
</compile_context>

<pallas_src>
import functools

import jax
import jax.numpy as jnp
import numpy as np
from jax.experimental import pallas as pl
from jax.experimental.pallas import tpu as pltpu

_STREAM_KEY = 0x0F0F0F0F   # one_hop key + sign bits
_STREAM_SIGN = 0x5A5A5A5A  # default-mode sign bits
_STREAM_IDX = 0x33CC33CC   # default-mode hop indices


def _random_u32(pos, seed, stream):
    """Counter-based PRNG: hash of (position, seed, stream) -> uint32 bits.

    pos: int32 array of unique element positions. seed: traced int32 scalar.
    stream: python int constant. Uses the lowbias32 finalizer (plain VPU ops)."""
    x = pos.astype(jnp.uint32) * jnp.uint32(0x9E3779B1)
    x = x + seed.astype(jnp.uint32) * jnp.uint32(0x85EBCA6B) + jnp.uint32(stream)
    x = x ^ (x >> jnp.uint32(16))
    x = x * jnp.uint32(0x7FEB352D)
    x = x ^ (x >> jnp.uint32(15))
    x = x * jnp.uint32(0x846CA68B)
    x = x ^ (x >> jnp.uint32(16))
    return x


def _khop_kernel(seed_ref, y_ref, out_ref, *, num_hops, num_samples_total,
                 num_vars, block_b, block_s, padded_vars, one_hop_per_dim):
    Bt, St, Vp = block_b, block_s, padded_vars
    V = num_vars
    seed = seed_ref[0]

    # Global offsets of this block (randomness is grid-invariant: it depends on
    # the global (b, s, v) coordinate, not on the tiling or program id directly).
    b_off = pl.program_id(0) * Bt
    s_off = pl.program_id(1) * St

    b_idx = jax.lax.broadcasted_iota(jnp.int32, (Bt, St, Vp), 0) + b_off
    s_idx = jax.lax.broadcasted_iota(jnp.int32, (Bt, St, Vp), 1) + s_off
    v_idx = jax.lax.broadcasted_iota(jnp.int32, (Bt, St, Vp), 2)
    lin = (b_idx * num_samples_total + s_idx) * Vp + v_idx  # unique per element

    if one_hop_per_dim:
        # One (Bt, St, Vp) random draw; high bits -> top-k key, bit 0 -> sign.
        bits = _random_u32(lin, seed, _STREAM_KEY)
        sign_bit = bits & jnp.uint32(1)

        # Integer key: (random high bits | lane index) -> all keys in a row are
        # distinct and non-negative; padded / knocked-out lanes get -1.
        lane_bits = max(1, (Vp - 1).bit_length())
        rnd = bits >> jnp.uint32(lane_bits + 1)          # < 2^(31 - lane_bits)
        key = ((rnd << jnp.uint32(lane_bits)) |
               v_idx.astype(jnp.uint32)).astype(jnp.int32)
        key = jnp.where(v_idx < V, key, jnp.int32(-1))

        def hop(_, carry):
            key, mag = carry
            cur = jnp.max(key, axis=-1, keepdims=True)   # exactly one match/row
            sel = key == cur
            return (jnp.where(sel, jnp.int32(-1), key),
                    mag + sel.astype(jnp.int32))

        _, mag = jax.lax.fori_loop(
            0, num_hops, hop,
            (key, jnp.zeros((Bt, St, Vp), jnp.int32)), unroll=True)
    else:
        # Sign bits: one full (Bt, St, Vp) draw.
        sbits = _random_u32(lin, seed, _STREAM_SIGN)
        sign_bit = sbits & jnp.uint32(1)

        # Hop indices are per (b, s, h): tiny compared to the (Bt, St, Vp) block.
        b_bs = jax.lax.broadcasted_iota(jnp.int32, (Bt, St, 1), 0) + b_off
        s_bs = jax.lax.broadcasted_iota(jnp.int32, (Bt, St, 1), 1) + s_off
        lin_bs = b_bs * num_samples_total + s_bs
        scale = jnp.float32(V / float(1 << 24))

        def hop(h, mag):
            hb = _random_u32(lin_bs * num_hops + h, seed, _STREAM_IDX)  # (Bt,St,1)
            u24 = (hb >> jnp.uint32(8)).astype(jnp.float32)             # [0, 2^24)
            idx_h = jnp.minimum(jnp.floor(u24 * scale).astype(jnp.int32),
                                jnp.int32(V - 1))                       # clamp
            # Only an int32 compare + add over the full block per hop.
            return mag + (v_idx == idx_h).astype(jnp.int32)

        mag = jax.lax.fori_loop(0, num_hops, hop,
                                jnp.zeros((Bt, St, Vp), jnp.int32), unroll=True)

    # Fused sign: +/- mag in int32, single cast to float, single add with y.
    signed_mag = jnp.where(sign_bit != jnp.uint32(0), mag, -mag)
    out_ref[...] = (y_ref[...] + signed_mag.astype(out_ref.dtype)).astype(
        out_ref.dtype)


def _choose_tiles(B, S, Vp, budget_bytes=6 * 1024 * 1024):
    """Pick (Bt, St) so ~10 live (Bt*St*Vp) i32/f32 temporaries stay under budget
    (well below the 32 MiB scoped-VMEM default; safe on v7x's 64 MiB VMEM)."""
    bytes_per_elem = 40
    max_elems = max(budget_bytes // bytes_per_elem, 8 * 128)
    if S * Vp <= max_elems:
        St = S
        Bt = max(1, min(B, max_elems // (S * Vp)))
    else:
        Bt = 1
        St = max(8, (max_elems // Vp) // 8 * 8)  # multiple of 8 (sublane rule)
        St = min(St, S)
    return Bt, St


def khop_sampler(a, b, c, y, *, num_hops, num_samples, one_hop_per_dim=False,
                 seed=0):
    """Pallas equivalent of KHopSampler(num_hops, num_samples, one_hop_per_dim).

    a, b, c are accepted for signature parity but unused (as in the reference)."""
    del a, b, c
    B, V = y.shape
    S = num_samples
    if one_hop_per_dim and num_hops > V:
        raise ValueError("one_hop_per_dim requires num_hops <= num_vars")

    # Lane-dense output: pad V up to a multiple of 128.
    Vp = max(128, ((V + 127) // 128) * 128)
    y_pad = y if Vp == V else jnp.pad(y, ((0, 0), (0, Vp - V)))
    y3 = y_pad.reshape(B, 1, Vp)

    Bt, St = _choose_tiles(B, S, Vp)
    grid = (pl.cdiv(B, Bt), pl.cdiv(S, St))

    kernel = functools.partial(
        _khop_kernel,
        num_hops=num_hops,
        num_samples_total=S,
        num_vars=V,
        block_b=Bt,
        block_s=St,
        padded_vars=Vp,
        one_hop_per_dim=one_hop_per_dim,
    )

    seed_arr = jnp.asarray([seed], dtype=jnp.int32)

    out_padded = pl.pallas_call(
        kernel,
        out_shape=jax.ShapeDtypeStruct((B, S, Vp), y.dtype),
        grid_spec=pltpu.PrefetchScalarGridSpec(
            num_scalar_prefetch=1,
            grid=grid,
            in_specs=[pl.BlockSpec((Bt, 1, Vp), lambda i, j, seed_ref: (i, 0, 0))],
            out_specs=pl.BlockSpec((Bt, St, Vp),
                                   lambda i, j, seed_ref: (i, j, 0)),
        ),
        compiler_params=pltpu.CompilerParams(
            dimension_semantics=("parallel", "parallel")),
    )(seed_arr, y3)

    return out_padded[:, :, :V] if Vp != V else out_padded


if __name__ == "__main__":
    key = jax.random.PRNGKey(0)
    ka, kb, kc, ky = jax.random.split(key, 4)

    B, V, M = 2, 16, 4           # batch, num_vars, num_constraints
    NUM_HOPS, NUM_SAMPLES = 2, 8

    # a, b, c are unused by the forward pass (kept for signature parity).
    a = jax.random.normal(ka, (B, M, V), dtype=jnp.float32)
    b = jax.random.normal(kb, (B, M), dtype=jnp.float32)
    c = jax.random.normal(kc, (B, V), dtype=jnp.float32)
    # y: integer-valued solution points, as floats.
    y = jnp.round(jax.random.uniform(ky, (B, V), minval=0.0, maxval=5.0)).astype(
        jnp.float32)

    # Default mode (hops sampled with replacement).
    out = khop_sampler(a, b, c, y, num_hops=NUM_HOPS, num_samples=NUM_SAMPLES,
                       one_hop_per_dim=False, seed=1234)
    out = jax.block_until_ready(out)

    # one_hop_per_dim mode (distinct dims, topk of uniforms).
    out2 = khop_sampler(a, b, c, y, num_hops=NUM_HOPS, num_samples=NUM_SAMPLES,
                        one_hop_per_dim=True, seed=4321)
    out2 = jax.block_until_ready(out2)

    # --- sanity checks against the reference semantics -----------------------
    yo = np.asarray(y)[:, None, :]

    d = np.asarray(out) - yo                       # (B, S, V)
    assert out.shape == (B, NUM_SAMPLES, V) and out.dtype == jnp.float32
    assert np.allclose(d, np.round(d))             # integer perturbations
    assert np.all(np.sum(np.abs(d), axis=-1) == NUM_HOPS)  # L1 distance == num_hops

    d2 = np.asarray(out2) - yo
    assert out2.shape == (B, NUM_SAMPLES, V) and out2.dtype == jnp.float32
    assert np.allclose(d2, np.round(d2))
    assert np.all(np.abs(d2) <= 1.0)               # distinct dims -> |delta| in {0,1}
    assert np.all(np.sum(np.abs(d2), axis=-1) == NUM_HOPS)

    print("KERNEL_OK")
</pallas_src>

<mosaic_0001>
module attributes {stable_mosaic.version = 11 : i64} {
  func.func @_khop_kernel(%arg0: i32, %arg1: i32, %arg2: memref<1xi32, #tpu.memory_space<smem>>, %arg3: memref<2x1x128xf32, #tpu.memory_space<vmem>>, %arg4: memref<2x8x128xf32, #tpu.memory_space<vmem>>) attributes {dimension_semantics = [#tpu.dimension_semantics<parallel>, #tpu.dimension_semantics<parallel>], iteration_bounds = array<i64: 1, 1>, scalar_prefetch = 1 : i64, scratch_operands = 0 : i64, tpu.core_type = #tpu.core_type<tc>, window_params = [{transform_indices = @transform_0, window_bounds = array<i64: 2, 1, 128>}, {transform_indices = @transform_1, window_bounds = array<i64: 2, 8, 128>}]} {
    %c0 = arith.constant 0 : index
    %0 = memref.load %arg2[%c0] : memref<1xi32, #tpu.memory_space<smem>>
    %c2_i32 = arith.constant 2 : i32
    %1 = arith.muli %arg0, %c2_i32 : i32
    %c8_i32 = arith.constant 8 : i32
    %2 = arith.muli %arg1, %c8_i32 : i32
    %3 = tpu.iota {dimensions = array<i32: 0>} : vector<2x8x128xi32>
    %4 = vector.broadcast %1 : i32 to vector<2x8x128xi32>
    %5 = arith.addi %3, %4 : vector<2x8x128xi32>
    %6 = tpu.iota {dimensions = array<i32: 1>} : vector<2x8x128xi32>
    %7 = vector.broadcast %2 : i32 to vector<2x8x128xi32>
    %8 = arith.addi %6, %7 : vector<2x8x128xi32>
    %9 = tpu.iota {dimensions = array<i32: 2>} : vector<2x8x128xi32>
    %c8_i32_0 = arith.constant 8 : i32
    %10 = vector.broadcast %c8_i32_0 : i32 to vector<2x8x128xi32>
    %11 = arith.muli %5, %10 : vector<2x8x128xi32>
    %12 = arith.addi %11, %8 : vector<2x8x128xi32>
    %c128_i32 = arith.constant 128 : i32
    %13 = vector.broadcast %c128_i32 : i32 to vector<2x8x128xi32>
    %14 = arith.muli %12, %13 : vector<2x8x128xi32>
    %15 = arith.addi %14, %9 : vector<2x8x128xi32>
    %c-1640531535_i32 = arith.constant -1640531535 : i32
    %16 = vector.broadcast %c-1640531535_i32 : i32 to vector<2x8x128xi32>
    %17 = arith.muli %15, %16 : vector<2x8x128xi32>
    %c-2048144789_i32 = arith.constant -2048144789 : i32
    %18 = arith.muli %0, %c-2048144789_i32 : i32
    %19 = vector.broadcast %18 : i32 to vector<2x8x128xi32>
    %20 = arith.addi %17, %19 : vector<2x8x128xi32>
    %c1515870810_i32 = arith.constant 1515870810 : i32
    %21 = vector.broadcast %c1515870810_i32 : i32 to vector<2x8x128xi32>
    %22 = arith.addi %20, %21 : vector<2x8x128xi32>
    %c16_i32 = arith.constant 16 : i32
    %23 = vector.broadcast %c16_i32 : i32 to vector<2x8x128xi32>
    %24 = arith.shrui %22, %23 : vector<2x8x128xi32>
    %25 = arith.xori %22, %24 : vector<2x8x128xi32>
    %c2146121005_i32 = arith.constant 2146121005 : i32
    %26 = vector.broadcast %c2146121005_i32 : i32 to vector<2x8x128xi32>
    %27 = arith.muli %25, %26 : vector<2x8x128xi32>
    %c15_i32 = arith.constant 15 : i32
    %28 = vector.broadcast %c15_i32 : i32 to vector<2x8x128xi32>
    %29 = arith.shrui %27, %28 : vector<2x8x128xi32>
    %30 = arith.xori %27, %29 : vector<2x8x128xi32>
    %c-2073254261_i32 = arith.constant -2073254261 : i32
    %31 = vector.broadcast %c-2073254261_i32 : i32 to vector<2x8x128xi32>
    %32 = arith.muli %30, %31 : vector<2x8x128xi32>
    %c16_i32_1 = arith.constant 16 : i32
    %33 = vector.broadcast %c16_i32_1 : i32 to vector<2x8x128xi32>
    %34 = arith.shrui %32, %33 : vector<2x8x128xi32>
    %35 = arith.xori %32, %34 : vector<2x8x128xi32>
    %c1_i32 = arith.constant 1 : i32
    %36 = vector.broadcast %c1_i32 : i32 to vector<2x8x128xi32>
    %37 = arith.andi %35, %36 : vector<2x8x128xi32>
    %38 = tpu.iota {dimensions = array<i32: 0>} : vector<2x8x1xi32>
    %39 = vector.broadcast %1 : i32 to vector<2x8x1xi32>
    %40 = arith.addi %38, %39 : vector<2x8x1xi32>
    %41 = tpu.iota {dimensions = array<i32: 1>} : vector<2x8x1xi32>
    %42 = vector.broadcast %2 : i32 to vector<2x8x1xi32>
    %43 = arith.addi %41, %42 : vector<2x8x1xi32>
    %c8_i32_2 = arith.constant 8 : i32
    %44 = vector.broadcast %c8_i32_2 : i32 to vector<2x8x1xi32>
    %45 = arith.muli %40, %44 : vector<2x8x1xi32>
    %46 = arith.addi %45, %43 : vector<2x8x1xi32>
    %c0_i32 = arith.constant 0 : i32
    %47 = vector.broadcast %c0_i32 : i32 to vector<2x8x128xi32>
    %cst = arith.constant 9.53674316E-7 : f32
    %c0_i32_3 = arith.constant 0 : i32
    %c2_i32_4 = arith.constant 2 : i32
    %48 = vector.broadcast %c2_i32_4 : i32 to vector<2x8x1xi32>
    %49 = arith.muli %46, %48 : vector<2x8x1xi32>
    %50 = vector.broadcast %c0_i32_3 : i32 to vector<2x8x1xi32>
    %51 = arith.addi %49, %50 : vector<2x8x1xi32>
    %c-1640531535_i32_5 = arith.constant -1640531535 : i32
    %52 = vector.broadcast %c-1640531535_i32_5 : i32 to vector<2x8x1xi32>
    %53 = arith.muli %51, %52 : vector<2x8x1xi32>
    %c-2048144789_i32_6 = arith.constant -2048144789 : i32
    %54 = arith.muli %0, %c-2048144789_i32_6 : i32
    %55 = vector.broadcast %54 : i32 to vector<2x8x1xi32>
    %56 = arith.addi %53, %55 : vector<2x8x1xi32>
    %c869020620_i32 = arith.constant 869020620 : i32
    %57 = vector.broadcast %c869020620_i32 : i32 to vector<2x8x1xi32>
    %58 = arith.addi %56, %57 : vector<2x8x1xi32>
    %c16_i32_7 = arith.constant 16 : i32
    %59 = vector.broadcast %c16_i32_7 : i32 to vector<2x8x1xi32>
    %60 = arith.shrui %58, %59 : vector<2x8x1xi32>
    %61 = arith.xori %58, %60 : vector<2x8x1xi32>
    %c2146121005_i32_8 = arith.constant 2146121005 : i32
    %62 = vector.broadcast %c2146121005_i32_8 : i32 to vector<2x8x1xi32>
    %63 = arith.muli %61, %62 : vector<2x8x1xi32>
    %c15_i32_9 = arith.constant 15 : i32
    %64 = vector.broadcast %c15_i32_9 : i32 to vector<2x8x1xi32>
    %65 = arith.shrui %63, %64 : vector<2x8x1xi32>
    %66 = arith.xori %63, %65 : vector<2x8x1xi32>
    %c-2073254261_i32_10 = arith.constant -2073254261 : i32
    %67 = vector.broadcast %c-2073254261_i32_10 : i32 to vector<2x8x1xi32>
    %68 = arith.muli %66, %67 : vector<2x8x1xi32>
    %c16_i32_11 = arith.constant 16 : i32
    %69 = vector.broadcast %c16_i32_11 : i32 to vector<2x8x1xi32>
    %70 = arith.shrui %68, %69 : vector<2x8x1xi32>
    %71 = arith.xori %68, %70 : vector<2x8x1xi32>
    %c8_i32_12 = arith.constant 8 : i32
    %72 = vector.broadcast %c8_i32_12 : i32 to vector<2x8x1xi32>
    %73 = arith.shrui %71, %72 : vector<2x8x1xi32>
    %74 = arith.uitofp %73 : vector<2x8x1xi32> to vector<2x8x1xf32>
    %75 = vector.broadcast %cst : f32 to vector<2x8x1xf32>
    %76 = arith.mulf %74, %75 : vector<2x8x1xf32>
    %77 = math.floor %76 : vector<2x8x1xf32>
    %78 = arith.fptosi %77 : vector<2x8x1xf32> to vector<2x8x1xi32>
    %c15_i32_13 = arith.constant 15 : i32
    %79 = vector.broadcast %c15_i32_13 : i32 to vector<2x8x1xi32>
    %80 = arith.minsi %78, %79 : vector<2x8x1xi32>
    %81 = vector.broadcast %80 : vector<2x8x1xi32> to vector<2x8x128xi32>
    %82 = arith.cmpi eq, %9, %81 : vector<2x8x128xi32>
    %83 = arith.extui %82 : vector<2x8x128xi1> to vector<2x8x128xi32>
    %84 = arith.addi %47, %83 : vector<2x8x128xi32>
    %c1_i32_14 = arith.constant 1 : i32
    %c2_i32_15 = arith.constant 2 : i32
    %85 = vector.broadcast %c2_i32_15 : i32 to vector<2x8x1xi32>
    %86 = arith.muli %46, %85 : vector<2x8x1xi32>
    %87 = vector.broadcast %c1_i32_14 : i32 to vector<2x8x1xi32>
    %88 = arith.addi %86, %87 : vector<2x8x1xi32>
    %c-1640531535_i32_16 = arith.constant -1640531535 : i32
    %89 = vector.broadcast %c-1640531535_i32_16 : i32 to vector<2x8x1xi32>
    %90 = arith.muli %88, %89 : vector<2x8x1xi32>
    %c-2048144789_i32_17 = arith.constant -2048144789 : i32
    %91 = arith.muli %0, %c-2048144789_i32_17 : i32
    %92 = vector.broadcast %91 : i32 to vector<2x8x1xi32>
    %93 = arith.addi %90, %92 : vector<2x8x1xi32>
    %c869020620_i32_18 = arith.constant 869020620 : i32
    %94 = vector.broadcast %c869020620_i32_18 : i32 to vector<2x8x1xi32>
    %95 = arith.addi %93, %94 : vector<2x8x1xi32>
    %c16_i32_19 = arith.constant 16 : i32
    %96 = vector.broadcast %c16_i32_19 : i32 to vector<2x8x1xi32>
    %97 = arith.shrui %95, %96 : vector<2x8x1xi32>
    %98 = arith.xori %95, %97 : vector<2x8x1xi32>
    %c2146121005_i32_20 = arith.constant 2146121005 : i32
    %99 = vector.broadcast %c2146121005_i32_20 : i32 to vector<2x8x1xi32>
    %100 = arith.muli %98, %99 : vector<2x8x1xi32>
    %c15_i32_21 = arith.constant 15 : i32
    %101 = vector.broadcast %c15_i32_21 : i32 to vector<2x8x1xi32>
    %102 = arith.shrui %100, %101 : vector<2x8x1xi32>
    %103 = arith.xori %100, %102 : vector<2x8x1xi32>
    %c-2073254261_i32_22 = arith.constant -2073254261 : i32
    %104 = vector.broadcast %c-2073254261_i32_22 : i32 to vector<2x8x1xi32>
    %105 = arith.muli %103, %104 : vector<2x8x1xi32>
    %c16_i32_23 = arith.constant 16 : i32
    %106 = vector.broadcast %c16_i32_23 : i32 to vector<2x8x1xi32>
    %107 = arith.shrui %105, %106 : vector<2x8x1xi32>
    %108 = arith.xori %105, %107 : vector<2x8x1xi32>
    %c8_i32_24 = arith.constant 8 : i32
    %109 = vector.broadcast %c8_i32_24 : i32 to vector<2x8x1xi32>
    %110 = arith.shrui %108, %109 : vector<2x8x1xi32>
    %111 = arith.uitofp %110 : vector<2x8x1xi32> to vector<2x8x1xf32>
    %112 = vector.broadcast %cst : f32 to vector<2x8x1xf32>
    %113 = arith.mulf %111, %112 : vector<2x8x1xf32>
    %114 = math.floor %113 : vector<2x8x1xf32>
    %115 = arith.fptosi %114 : vector<2x8x1xf32> to vector<2x8x1xi32>
    %c15_i32_25 = arith.constant 15 : i32
    %116 = vector.broadcast %c15_i32_25 : i32 to vector<2x8x1xi32>
    %117 = arith.minsi %115, %116 : vector<2x8x1xi32>
    %118 = vector.broadcast %117 : vector<2x8x1xi32> to vector<2x8x128xi32>
    %119 = arith.cmpi eq, %9, %118 : vector<2x8x128xi32>
    %120 = arith.extui %119 : vector<2x8x128xi1> to vector<2x8x128xi32>
    %121 = arith.addi %84, %120 : vector<2x8x128xi32>
    %c2_i32_26 = arith.constant 2 : i32
    %c0_i32_27 = arith.constant 0 : i32
    %122 = vector.broadcast %c0_i32_27 : i32 to vector<2x8x128xi32>
    %123 = arith.cmpi ne, %37, %122 : vector<2x8x128xi32>
    %c0_i32_28 = arith.constant 0 : i32
    %124 = vector.broadcast %c0_i32_28 : i32 to vector<2x8x128xi32>
    %125 = arith.subi %124, %121 : vector<2x8x128xi32>
    %126 = arith.select %123, %121, %125 : vector<2x8x128xi1>, vector<2x8x128xi32>
    %c0_29 = arith.constant 0 : index
    %c0_30 = arith.constant 0 : index
    %c0_31 = arith.constant 0 : index
    %127 = vector.load %arg3[%c0_29, %c0_30, %c0_31] : memref<2x1x128xf32, #tpu.memory_space<vmem>>, vector<2x1x128xf32>
    %128 = arith.sitofp %126 : vector<2x8x128xi32> to vector<2x8x128xf32>
    %129 = vector.broadcast %127 : vector<2x1x128xf32> to vector<2x8x128xf32>
    %130 = arith.addf %129, %128 : vector<2x8x128xf32>
    %c0_32 = arith.constant 0 : index
    %c0_33 = arith.constant 0 : index
    %c0_34 = arith.constant 0 : index
    %131 = vector.load %arg4[%c0_32, %c0_33, %c0_34] : memref<2x8x128xf32, #tpu.memory_space<vmem>>, vector<2x8x128xf32>
    tpu.vector_store %arg4[%c0_32, %c0_33, %c0_34], %130 {strides = array<i32>} : memref<2x8x128xf32, #tpu.memory_space<vmem>>, vector<2x8x128xf32>,
    return
  }
  func.func @transform_0(%arg0: i32, %arg1: i32, %arg2: memref<1xi32, #tpu.memory_space<smem>>) -> (i32, i32, i32) {
    %c0_i32 = arith.constant 0 : i32
    %c0_i32_0 = arith.constant 0 : i32
    %c0_i32_1 = arith.constant 0 : i32
    return %arg0, %c0_i32, %c0_i32_0 : i32, i32, i32
  }
  func.func @transform_1(%arg0: i32, %arg1: i32, %arg2: memref<1xi32, #tpu.memory_space<smem>>) -> (i32, i32, i32) {
    %c0_i32 = arith.constant 0 : i32
    %c0_i32_0 = arith.constant 0 : i32
    return %arg0, %arg1, %c0_i32 : i32, i32, i32
  }
}

</mosaic_0001>

<bundles_post_ra>
// kernel: tpu_custom_call.1
= control target key start
LH: loop header
LB: loop body
LE: loop exit
PB: predicated region body
PF: predicated region fallthrough
CT: control target
= control target key end

     0   :  { %v16_v0 = vlaneseq  ;;  %s279_s0 = inlined_call_operand.<no memory space> [shape: s32[1], index: 0, kind: input, shape index: {}]   ;;  %s280_s1 = inlined_call_operand.vmem [shape: f32[2,1,128], index: 1, kind: input, shape index: {}]   ;;  %s281_s2 = inlined_call_operand.hbm [shape: f32[2,8,128], index: 2, kind: output, shape index: {}]  }
   0x1   :  { %s32_s11 = smul.u32 2246822507, %s279_s0 }
   0x2   :  { %8 = vsyncpa [#allocation5], 0  ;;  %v17_v1 = vshrl.u32 %v16_v0, 7  ;;  %v262_v2 = vand.u32 127, %v16_v0  ;;  %s241_s15 = smov [#allocation4]   ;;  %s188_s19 = sshll.u32 %s281_s2, 4  ;;  %s189_s19 = int_to_ptr.hbm [resolvable:$true] %s188_s19 }
   0x3   :  { %v33_v6 = vstv %s32_s11  ;;  %s186_s16 = sshll.u32 %s241_s15, 4  ;;  %s242_s20 = smov 128   ;;  %s187_s16 = int_to_ptr.vmem [resolvable:$true] %s186_s16 }
   0x4   :  { %v26_v3 = vmul.u32 128, %v17_v1  ;;  %v56_v4 = vmul.u32 2, %v17_v1  ;;  %v25_v5 = vadd.s32 8, %v17_v1  ;;  %s243_s21 = smov 8  }
   0x6   :  { %v28_v7 = vadd.s32 %v26_v3, %v262_v2  ;;  %v58_v8 = vmul.u32 2654435761, %v56_v4  ;;  %v108_v9 = vadd.s32 1, %v56_v4  ;;  %v27_v10 = vmul.u32 128, %v25_v5 }
   0x7   :  { %v57_v11 = vmul.u32 2, %v25_v5 }
   0x8   :  { %v30_v12 = vmul.u32 2654435761, %v28_v7  ;;  %v60_v13 = vadd.s32 %v58_v8, %v33_v6  ;;  %v110_v14 = vmul.u32 2654435761, %v108_v9  ;;  %v29_v15 = vadd.s32 %v27_v10, %v262_v2 }
   0x9   :  { %v59_v16 = vmul.u32 2654435761, %v57_v11  ;;  %v109_v17 = vadd.s32 1, %v57_v11 }
   0xa   :  { %v34_v18 = vadd.s32 %v33_v6, %v30_v12  ;;  %v62_v19 = vadd.s32 869020620, %v60_v13  ;;  %v112_v20 = vadd.s32 %v110_v14, %v33_v6  ;;  %v31_v21 = vmul.u32 2654435761, %v29_v15 }
   0xb   :  { %v61_v22 = vadd.s32 %v59_v16, %v33_v6  ;;  %v111_v23 = vmul.u32 2654435761, %v109_v17 }
   0xc   :  { %v36_v24 = vadd.s32 1515870810, %v34_v18  ;;  %v64_v25 = vshrl.u32 %v62_v19, 16  ;;  %v114_v26 = vadd.s32 869020620, %v112_v20  ;;  %v35_v27 = vadd.s32 %v33_v6, %v31_v21 }
   0xd   :  { %v63_v28 = vadd.s32 869020620, %v61_v22  ;;  %v113_v29 = vadd.s32 %v111_v23, %v33_v6 }
   0xe   :  { %v38_v30 = vshrl.u32 %v36_v24, 16  ;;  %v66_v31 = vxor.u32 %v64_v25, %v62_v19  ;;  %v116_v32 = vshrl.u32 %v114_v26, 16  ;;  %v37_v33 = vadd.s32 1515870810, %v35_v27 }
   0xf   :  { %v65_v34 = vshrl.u32 %v63_v28, 16  ;;  %v115_v35 = vadd.s32 869020620, %v113_v29 }
  0x10   :  { %v68_v36 = vmul.u32 2146121005, %v66_v31  ;;  %v118_v37 = vxor.u32 %v116_v32, %v114_v26  ;;  %v40_v38 = vxor.u32 %v38_v30, %v36_v24  ;;  %v39_v43 = vshrl.u32 %v37_v33, 16 }
  0x11   :  { %v67_v39 = vxor.u32 %v65_v34, %v63_v28  ;;  %v117_v40 = vshrl.u32 %v115_v35, 16 }
  0x12   :  { %v70_v41 = vshrl.u32 %v68_v36, 15  ;;  %v120_v42 = vmul.u32 2146121005, %v118_v37  ;;  %v42_v48 = vmul.u32 2146121005, %v40_v38  ;;  %v41_v53 = vxor.u32 %v39_v43, %v37_v33 }
  0x13   :  { %v69_v44 = vmul.u32 2146121005, %v67_v39  ;;  %v119_v45 = vxor.u32 %v117_v40, %v115_v35 }
  0x14   :  { %v72_v46 = vxor.u32 %v70_v41, %v68_v36  ;;  %v122_v47 = vshrl.u32 %v120_v42, 15  ;;  %v44_v58 = vshrl.u32 %v42_v48, 15  ;;  %v43_v63 = vmul.u32 2146121005, %v41_v53 }
  0x15   :  { %v71_v49 = vshrl.u32 %v69_v44, 15  ;;  %v121_v50 = vmul.u32 2146121005, %v119_v45 }
  0x16   :  { %v74_v51 = vmul.u32 2221713035, %v72_v46  ;;  %v124_v52 = vxor.u32 %v122_v47, %v120_v42  ;;  %v46_v5 = vxor.u32 %v44_v58, %v42_v48  ;;  %v45_v11 = vshrl.u32 %v43_v63, 15 }
  0x17   :  { %v73_v54 = vxor.u32 %v71_v49, %v69_v44  ;;  %v123_v55 = vshrl.u32 %v121_v50, 15 }
  0x18   :  { %v76_v56 = vshrl.u32 %v74_v51, 16  ;;  %v126_v57 = vmul.u32 2221713035, %v124_v52  ;;  %v48_v18 = vmul.u32 2221713035, %v46_v5  ;;  %v47_v25 = vxor.u32 %v45_v11, %v43_v63 }
  0x19   :  { %v75_v59 = vmul.u32 2221713035, %v73_v54  ;;  %v125_v60 = vxor.u32 %v123_v55, %v121_v50  ;;  %v212_v5 = vld [vmem:[%s280_s1] ss:$0 sm:$0xff] }
  0x1a   :  { %v78_v61 = vxor.u32 %v76_v56, %v74_v51  ;;  %v128_v62 = vshrl.u32 %v126_v57, 16  ;;  %v50_v32 = vshrl.u32 %v48_v18, 16  ;;  %v49_v38 = vmul.u32 2221713035, %v47_v25 }
  0x1b   :  { %v77_v0 = vshrl.u32 %v75_v59, 16  ;;  %v127_v1 = vmul.u32 2221713035, %v125_v60  ;;  %v240_v56 = vmov 0  }
  0x1c   :  { %v80_v3 = vshrl.u32 %v78_v61, 8  ;;  %v130_v4 = vxor.u32 %v128_v62, %v126_v57  ;;  %v52_v44 = vxor.u32 %v50_v32, %v48_v18  ;;  %v51_v48 = vshrl.u32 %v49_v38, 16 }
  0x1d   :  { %v79_v6 = vxor.u32 %v77_v0, %v75_v59  ;;  %v129_v7 = vshrl.u32 %v127_v1, 16 }
  0x1e   :  { %v82_v8 = vshrl.u32 %v80_v3, 16  ;;  %v83_v9 = vand.u32 65535, %v80_v3  ;;  %v132_v10 = vshrl.u32 %v130_v4, 8  ;;  %v54_v54 = vand.u32 1, %v52_v44 }
  0x1f   :  { %v81_v12 = vshrl.u32 %v79_v6, 8  ;;  %v131_v13 = vxor.u32 %v129_v7, %v127_v1  ;;  %v53_v59 = vxor.u32 %v51_v48, %v49_v38 }
  0x20   :  { %v84_v14 = vcvt.s32.f32 %v82_v8  ;;  %v86_v15 = vcvt.s32.f32 %v83_v9  ;;  %v134_v16 = vshrl.u32 %v132_v10, 16  ;;  %v135_v17 = vand.u32 65535, %v132_v10 }
  0x21   :  { %v88_v19 = vshrl.u32 %v81_v12, 16  ;;  %v89_v20 = vand.u32 65535, %v81_v12  ;;  %v133_v24 = vshrl.u32 %v131_v13, 8  ;;  %vm162_vm7 = vcmp.ne.s32.totalorder %v54_v54, 0  ;;  %v213_v12 = vld [vmem:[%s280_s1 + $0x1] ss:$0 sm:$0xff] }
  0x22   :  { %v85_v21 = vmul.f32 65536.0, %v84_v14  ;;  %v136_v22 = vcvt.s32.f32 %v134_v16  ;;  %v138_v23 = vcvt.s32.f32 %v135_v17  ;;  %v55_v0 = vand.u32 1, %v53_v59 }
  0x23   :  { %v90_v26 = vcvt.s32.f32 %v88_v19  ;;  %v92_v27 = vcvt.s32.f32 %v89_v20  ;;  %v140_v30 = vshrl.u32 %v133_v24, 16  ;;  %v141_v31 = vand.u32 65535, %v133_v24 }
  0x24   :  { %v87_v28 = vadd.f32 %v86_v15, %v85_v21  ;;  %v137_v29 = vmul.f32 65536.0, %v136_v22  ;;  %vm163_vm9 = vcmp.ne.s32.totalorder %v55_v0, 0 }
  0x25   :  { %v91_v33 = vmul.f32 65536.0, %v90_v26  ;;  %v142_v36 = vcvt.s32.f32 %v140_v30  ;;  %v144_v37 = vcvt.s32.f32 %v141_v31 }
  0x26   :  { %v94_v34 = vmul.f32 9.536743e-07, %v87_v28  ;;  %v139_v35 = vadd.f32 %v138_v23, %v137_v29 }
  0x27   :  { %v93_v39 = vadd.f32 %v92_v27, %v91_v33  ;;  %v143_v42 = vmul.f32 65536.0, %v142_v36 }
  0x28   :  { %v96_v40 = vfloor.f32 %v94_v34  ;;  %v146_v41 = vmul.f32 9.536743e-07, %v139_v35 }
  0x29   :  { %v95_v43 = vmul.f32 9.536743e-07, %v93_v39  ;;  %v145_v47 = vadd.f32 %v144_v37, %v143_v42 }
  0x2a   :  { %v201_v45 = vcvt.f32.s32 %v96_v40  ;;  %v148_v46 = vfloor.f32 %v146_v41 }
  0x2b   :  { %v97_v49 = vfloor.f32 %v95_v43  ;;  %v147_v51 = vmul.f32 9.536743e-07, %v145_v47 }
  0x2c   :  { %vm100_vm0 = vcmp.lt.s32.totalorder %v201_v45, 15  ;;  %v205_v50 = vcvt.f32.s32 %v148_v46 }
  0x2d   :  { %v101_v52 = vsel %vm100_vm0, %v201_v45, 15  ;;  %v203_v53 = vcvt.f32.s32 %v97_v49  ;;  %v149_v55 = vfloor.f32 %v147_v51 }
  0x2e   :  { %vm104_vm1 = vcmp.eq.s32.totalorder %v262_v2, %v101_v52  ;;  %vm152_vm2 = vcmp.lt.s32.totalorder %v205_v50, 15 }
  0x2f   :  { %v106_v57 = vsel %vm104_vm1, 1, %v240_v56  ;;  %v153_v58 = vsel %vm152_vm2, %v205_v50, 15  ;;  %vm102_vm3 = vcmp.lt.s32.totalorder %v203_v53, 15  ;;  %v207_v61 = vcvt.f32.s32 %v149_v55 }
  0x30   :  { %vm156_vm4 = vcmp.eq.s32.totalorder %v262_v2, %v153_v58  ;;  %v103_v60 = vsel %vm102_vm3, %v203_v53, 15 }
  0x31   :  { %v158_v62 = vsel %vm156_vm4, 1, %v240_v56  ;;  %vm105_vm5 = vcmp.eq.s32.totalorder %v262_v2, %v103_v60  ;;  %vm154_vm6 = vcmp.lt.s32.totalorder %v207_v61, 15 }
  0x32   :  { %v160_v63 = vadd.s32 %v158_v62, %v106_v57  ;;  %v107_v1 = vsel %vm105_vm5, 1, %v240_v56  ;;  %v155_v3 = vsel %vm154_vm6, %v207_v61, 15 }
  0x33   :  { %vm157_vm8 = vcmp.eq.s32.totalorder %v262_v2, %v155_v3 }
  0x34   :  { %v164_v4 = vsub.s32 0, %v160_v63  ;;  %v159_v6 = vsel %vm157_vm8, 1, %v240_v56 }
  0x35   :  { %v161_v8 = vadd.s32 %v159_v6, %v107_v1 }
  0x36   :  { %v166_v7 = vsel %vm162_vm7, %v160_v63, %v164_v4 }
  0x37   :  { %v170_v9 = vcvt.s32.f32 %v166_v7  ;;  %v165_v10 = vsub.s32 0, %v161_v8 }
  0x39   :  { %v178_v11 = vadd.f32 %v212_v5, %v170_v9  ;;  %v167_v2 = vsel %vm163_vm9, %v161_v8, %v165_v10 }
  0x3a   :  { %v171_v13 = vcvt.s32.f32 %v167_v2 }
  0x3b   :  { %180 = vst [vmem:[#allocation4] sm:$0xff] %v178_v11 }
  0x3c   :  { %v179_v14 = vadd.f32 %v213_v12, %v171_v13 }
  0x3e   :  { %181 = vst [vmem:[#allocation4 + $0x8] sm:$0xff] %v179_v14 }
  0x3f   :  { %194 = dma.vmem_to_hbm [thread:$0]  %s187_s16, 256, %s189_s19, [#allocation5], %s242_s20, %s242_s20, %s243_s21  }
  0x40   :  { %238 = dma.done.wait [#allocation5], 256  }
  0x41   :  { %239 = vsyncadd [#allocation5], 4294967040 }
  0x42   :  { %199 = vsyncpa [#allocation5], 1 }

</bundles_post_ra>
